<compile_context>
chip_gen: v7x
topology: tpu7x:2x2x1
jax: 0.10.0
libtpu: 0.0.40
codegen_flags: <defaults>
</compile_context>

<pallas_src>
import functools

import jax
import jax.numpy as jnp
from jax.experimental import pallas as pl
from jax.experimental.pallas import tpu as pltpu


def _round_up(x, m):
    return ((x + m - 1) // m) * m


def _glu_kernel(x_ref, w_ref, b_ref, o_ref, *, n_out):
    x = x_ref[...]
    # Single fused matmul on the MXU, f32 accumulation: (tm, K) @ (K, 2N).
    lr = jnp.dot(x, w_ref[...], preferred_element_type=jnp.float32) + b_ref[...]
    left = lr[:, :n_out]
    right = lr[:, n_out:]
    # Gate: left * sigmoid(right)  (sigmoid -> EUP, mul -> VPU), all in f32.
    o_ref[...] = (left * jax.nn.sigmoid(right)).astype(o_ref.dtype)


@functools.partial(jax.jit, static_argnames=("block_m", "use_bf16_matmul"))
def glu_forward(x, w_left, b_left, w_right, b_right, *, block_m=512,
                use_bf16_matmul=False):
    """x: (..., K); w_*: (K, N); b_*: (N,). Returns (..., N)."""
    orig_shape = x.shape
    K = orig_shape[-1]
    N = w_left.shape[1]
    out_dtype = x.dtype

    x2 = x.reshape(-1, K)
    M = x2.shape[0]

    # Fuse the two projections: one (K, 2N) weight, one (1, 2N) bias.
    w_cat = jnp.concatenate([w_left, w_right], axis=1)              # (K, 2N)
    b_cat = jnp.concatenate([b_left, b_right]).reshape(1, 2 * N)
    b_cat = b_cat.astype(jnp.float32)

    if use_bf16_matmul:
        # Halve HBM traffic on the dominant operands (v6e/v7x); f32 accum.
        x2 = x2.astype(jnp.bfloat16)
        w_cat = w_cat.astype(jnp.bfloat16)
    mm_itemsize = jnp.dtype(x2.dtype).itemsize
    out_itemsize = jnp.dtype(out_dtype).itemsize

    # Row tile: as large as allowed (multiple of 8), no wrapper-side padding.
    tm = min(block_m, _round_up(M, 8))
    tm = _round_up(tm, 8)
    # Keep >= 2 grid iterations when possible so megacore (v7x) uses both TCs.
    if M > 8 and pl.cdiv(M, tm) < 2:
        tm = _round_up(pl.cdiv(M, 2), 8)
    grid_m = pl.cdiv(M, tm)

    # VMEM budget: double-buffered x and out tiles + resident weights/bias.
    vmem_needed = (
        2 * tm * K * mm_itemsize           # x row tile (double buffered)
        + 2 * tm * N * out_itemsize        # output tile (double buffered)
        + 2 * (K * 2 * N * mm_itemsize)    # fused weight (default 2 buffers)
        + 2 * (2 * N * 4)                  # fused bias
        + (2 << 20)                        # headroom for compiler temporaries
    )
    vmem_limit = int(min(max(vmem_needed, 16 * 1024 * 1024), 64 * 1024 * 1024))

    cost = pl.CostEstimate(
        flops=2 * M * K * (2 * N),
        transcendentals=M * N,                       # sigmoid
        bytes_accessed=(M * K * mm_itemsize
                        + K * 2 * N * mm_itemsize
                        + 2 * N * 4
                        + M * N * out_itemsize),
    )

    kernel = functools.partial(_glu_kernel, n_out=N)

    out = pl.pallas_call(
        kernel,
        out_shape=jax.ShapeDtypeStruct((M, N), out_dtype),
        grid_spec=pltpu.PrefetchScalarGridSpec(
            num_scalar_prefetch=0,
            grid=(grid_m,),
            in_specs=[
                pl.BlockSpec((tm, K), lambda i: (i, 0)),       # x row tile
                pl.BlockSpec((K, 2 * N), lambda i: (0, 0)),    # fused weight
                pl.BlockSpec((1, 2 * N), lambda i: (0, 0)),    # fused bias
            ],
            out_specs=pl.BlockSpec((tm, N), lambda i: (i, 0)),
        ),
        compiler_params=pltpu.CompilerParams(
            dimension_semantics=("parallel",),
            vmem_limit_bytes=vmem_limit,
        ),
        cost_estimate=cost,
    )(x2, w_cat, b_cat)

    return out.reshape(orig_shape[:-1] + (N,))


def init_glu_params(key, input_channel, output_channel, dtype=jnp.float32):
    """Deterministic init matching nn.Linear shapes.
    PyTorch stores weight as (out, in); we pre-transpose to (in, out)."""
    k1, k2, k3, k4 = jax.random.split(key, 4)
    bound = 1.0 / (input_channel ** 0.5)
    w_left = jax.random.uniform(k1, (input_channel, output_channel), dtype, -bound, bound)
    b_left = jax.random.uniform(k2, (output_channel,), dtype, -bound, bound)
    w_right = jax.random.uniform(k3, (input_channel, output_channel), dtype, -bound, bound)
    b_right = jax.random.uniform(k4, (output_channel,), dtype, -bound, bound)
    return w_left, b_left, w_right, b_right


if __name__ == "__main__":
    key = jax.random.PRNGKey(0)
    kx, kp = jax.random.split(key)

    batch, seq, input_channel, output_channel = 2, 8, 32, 32
    x = jax.random.normal(kx, (batch, seq, input_channel), dtype=jnp.float32)
    w_left, b_left, w_right, b_right = init_glu_params(kp, input_channel, output_channel)

    # f32 path (default): tight tolerance against the pure-JAX reference.
    out = glu_forward(x, w_left, b_left, w_right, b_right)
    out = jax.block_until_ready(out)

    ref = (x @ w_left + b_left) * jax.nn.sigmoid(x @ w_right + b_right)
    assert out.shape == (batch, seq, output_channel)
    assert jnp.allclose(out, ref, atol=1e-5, rtol=1e-5)

    # bf16-MXU-operand path (v6e/v7x bandwidth optimization): looser tolerance.
    out_bf16 = glu_forward(x, w_left, b_left, w_right, b_right, use_bf16_matmul=True)
    out_bf16 = jax.block_until_ready(out_bf16)
    assert out_bf16.shape == (batch, seq, output_channel)
    assert jnp.allclose(out_bf16, ref, atol=3e-2, rtol=3e-2)

    print("KERNEL_OK")
</pallas_src>

<mosaic_0001>
module attributes {stable_mosaic.version = 11 : i64} {
  func.func @_glu_kernel(%arg0: i32, %arg1: memref<8x32xf32, #tpu.memory_space<vmem>>, %arg2: memref<32x64xf32, #tpu.memory_space<vmem>>, %arg3: memref<1x64xf32, #tpu.memory_space<vmem>>, %arg4: memref<8x32xf32, #tpu.memory_space<vmem>>) attributes {dimension_semantics = [#tpu.dimension_semantics<parallel>], iteration_bounds = array<i64: 2>, scalar_prefetch = 0 : i64, scratch_operands = 0 : i64, tpu.core_type = #tpu.core_type<tc>, window_params = [{transform_indices = @transform_0, window_bounds = array<i64: 8, 32>}, {pipeline_mode = #tpu.pipeline_mode<synchronous>, transform_indices = @transform_1, window_bounds = array<i64: 32, 64>}, {pipeline_mode = #tpu.pipeline_mode<synchronous>, transform_indices = @transform_2, window_bounds = array<i64: 1, 64>}, {transform_indices = @transform_3, window_bounds = array<i64: 8, 32>}]} {
    %c0 = arith.constant 0 : index
    %c0_0 = arith.constant 0 : index
    %0 = vector.load %arg1[%c0, %c0_0] : memref<8x32xf32, #tpu.memory_space<vmem>>, vector<8x32xf32>
    %c0_1 = arith.constant 0 : index
    %c0_2 = arith.constant 0 : index
    %1 = vector.load %arg2[%c0_1, %c0_2] : memref<32x64xf32, #tpu.memory_space<vmem>>, vector<32x64xf32>
    %cst = arith.constant dense<0.000000e+00> : vector<8x64xf32>
    %2 = tpu.matmul %0, %1, %cst {dimension_numbers = #tpu.dot_dimension_numbers<[1], [0], [0], [1], [0, 0, 1, 1], [], []>} : vector<8x32xf32>, vector<32x64xf32>, vector<8x64xf32> -> vector<8x64xf32>
    %c0_3 = arith.constant 0 : index
    %c0_4 = arith.constant 0 : index
    %3 = vector.load %arg3[%c0_3, %c0_4] : memref<1x64xf32, #tpu.memory_space<vmem>>, vector<1x64xf32>
    %4 = vector.broadcast %3 : vector<1x64xf32> to vector<8x64xf32>
    %5 = arith.addf %2, %4 : vector<8x64xf32>
    %6 = vector.extract_strided_slice %5 {offsets = [0, 0], sizes = [8, 32], strides = [1, 1]} : vector<8x64xf32> to vector<8x32xf32>
    %7 = vector.extract_strided_slice %5 {offsets = [0, 32], sizes = [8, 32], strides = [1, 1]} : vector<8x64xf32> to vector<8x32xf32>
    %8 = arith.negf %7 : vector<8x32xf32>
    %9 = math.exp %8 : vector<8x32xf32>
    %cst_5 = arith.constant 1.000000e+00 : f32
    %10 = vector.broadcast %cst_5 : f32 to vector<8x32xf32>
    %11 = arith.addf %10, %9 : vector<8x32xf32>
    %12 = arith.divf %10, %11 : vector<8x32xf32>
    %13 = arith.mulf %6, %12 : vector<8x32xf32>
    %c0_6 = arith.constant 0 : index
    %c0_7 = arith.constant 0 : index
    %14 = vector.load %arg4[%c0_6, %c0_7] : memref<8x32xf32, #tpu.memory_space<vmem>>, vector<8x32xf32>
    tpu.vector_store %arg4[%c0_6, %c0_7], %13 {strides = array<i32>} : memref<8x32xf32, #tpu.memory_space<vmem>>, vector<8x32xf32>,
    return
  }
  func.func @transform_0(%arg0: i32) -> (i32, i32) {
    %c0_i32 = arith.constant 0 : i32
    %c0_i32_0 = arith.constant 0 : i32
    return %arg0, %c0_i32 : i32, i32
  }
  func.func @transform_1(%arg0: i32) -> (i32, i32) {
    %c0_i32 = arith.constant 0 : i32
    %c0_i32_0 = arith.constant 0 : i32
    %c0_i32_1 = arith.constant 0 : i32
    return %c0_i32, %c0_i32_0 : i32, i32
  }
  func.func @transform_2(%arg0: i32) -> (i32, i32) {
    %c0_i32 = arith.constant 0 : i32
    %c0_i32_0 = arith.constant 0 : i32
    %c0_i32_1 = arith.constant 0 : i32
    return %c0_i32, %c0_i32_0 : i32, i32
  }
  func.func @transform_3(%arg0: i32) -> (i32, i32) {
    %c0_i32 = arith.constant 0 : i32
    %c0_i32_0 = arith.constant 0 : i32
    return %arg0, %c0_i32 : i32, i32
  }
}

</mosaic_0001>

<bundles_post_ra>
// kernel: glu_forward.1
= control target key start
LH: loop header
LB: loop body
LE: loop exit
PB: predicated region body
PF: predicated region fallthrough
CT: control target
= control target key end

     0   :  { %8 = vsyncpa [#allocation3], 0  ;;  %s625_s0 = inlined_call_operand.vmem [shape: f32[16,32], index: 0, kind: input, shape index: {}]   ;;  %s626_s1 = inlined_call_operand.vmem [shape: f32[32,64], index: 1, kind: input, shape index: {}]   ;;  %s627_s2 = inlined_call_operand.vmem [shape: f32[1,64], index: 2, kind: input, shape index: {}]   ;;  %s628_s3 = inlined_call_operand.hbm [shape: f32[16,32], index: 3, kind: output, shape index: {}]  }
   0x1   :  { %10 = vsyncpa [#allocation3 + $0x1], 0  ;;  %s508_s12 = smov 0   ;;  %s510_s13 = smov 0  }
   0x2   :  { %s512_s14 = smov 0   ;;  %s514_s15 = smov 0  }
   0x3 LB: > { %s529_s16 = sadd.s32 4294967295, %s481_s15   ;;  %s337_s17 = sadd.s32 4294967294, %s481_s15   ;;  %s481_s15 = sphi %s514_s15, %s634_s15   ;;  %s477_s14 = sphi %s512_s14, %s633_s14   ;;  %s473_s13 = sphi %s510_s13, %s632_s13   ;;  %s469_s12 = sphi %s508_s12, %s631_s12  }
   0x4   : > { %s533_s18 = sadd.s32 1, %s481_s15   ;;  %s91_s19 = sadd.s32 1, %s477_s14 }
   0x5   : > { %s88_s20 = ssub.s32 %s481_s15, %s533_s18  ;;  %p101_p0 = scmp.ne.s32.totalorder %s477_s14, %s473_s13 }
   0x6   : > { %p89_p1 = scmp.eq.s32.totalorder %s88_s20, 0  ;;  %p102_p2 = scmp.eq.s32.totalorder %s529_s16, 1 }
   0x7   : > { %p107_p3 = scmp.ne.s32.totalorder %s473_s13, %s469_s12  ;;  %p108_p4 = scmp.eq.s32.totalorder %s337_s17, 1 }
   0x8   : > { %s544_s21 = scalar_select %p89_p1, %s477_s14, %s91_s19  }
   0x9   : > { %p546_p5 = por %p102_p2, %p101_p0  ;;  %p550_p6 = por %p108_p4, %p107_p3 }
   0xa   : > { %p340_p7 = scmp.ge.s32.totalorder %s481_s15, 1  ;;  %p139_p8 = scmp.lt.s32.totalorder %s481_s15, 3 }
   0xc   : > { %p140_p9 = pnand %p340_p7, %p139_p8 }
   0xd   : > { %v167_v0 = vld [vmem:[%s626_s1] sm:$0xff] (!%p140_p9)  ;;  %v168_v1 = vld [vmem:[%s626_s1 + $0x8] sm:$0xff] (!%p140_p9)  ;;  %v169_v2 = vld [vmem:[%s626_s1 + $0x10] sm:$0xff] (!%p140_p9)  ;;  %v483_v3 = vmov (!%p140_p9), 0.0|0.0   ;;  %vm484_vm0 = vmmov (!%p140_p9), 0   ;;  %v485_v6 = vmov (!%p140_p9), 0.0  }
   0xe   : > { %143 = sbr.rel (%p140_p9) target bundleno = 397 (0x18d), region = 32  ;;  %366 = vmatprep.subr.bf16.mxu0 (!%p140_p9), %v483_v3  ;;  %v367_v4 = vpack.c.bf16 (!%p140_p9), %v168_v1, %v167_v0  ;;  %v170_v5 = vld [vmem:[%s626_s1 + $0x18] sm:$0xff] (!%p140_p9)  ;;  %363 = vmatprep.mubr.msk.f32.mxu0 (!%p140_p9), %vm484_vm0, %v485_v6  ;;  %p162_p10 = scmp.lt.s32.totalorder (!%p140_p9), %s529_s16, 1  ;;  %vm178_vm1 = vcmask (!%p140_p9), 261120   ;;  %v343_v9 = vld [vmem:[%s627_s2] ss:$0 sm:$0xff] (!%p140_p9) }
   0xf   : > { %v370_v7 = vpack.c.bf16 (!%p140_p9), %v170_v5, %v169_v2  ;;  %s486_s17 = smov (!%p140_p9), 96   ;;  %s159_s19 = sand.u32 (!%p140_p9), 1, %s473_s13  }
  0x10   : > { %368 = vmatpush3.bf16.msra.mxu0 (!%p140_p9), %v367_v4  ;;  %s341_s20 = sshll.u32 (!%p140_p9), %s159_s19, 3  ;;  %s347_s24 = sshll.u32 (!%p140_p9), %s529_s16, 7 }
  0x11   : > { %369 = vmatprep.subr.bf16.mxu0 (!%p140_p9), %v483_v3  ;;  %s161_s25 = scalar_lea.vmem (!%p140_p9), [#allocation2], %s341_s20  ;;  %s582_s29 = scalar_lea.hbm (!%p140_p9), %s628_s3, %s347_s24 }
  0x12   : > { %s278_s26 = sshll.u32 (!%p140_p9), %s161_s25, 4  ;;  %s265_s30 = scalar_lea.sflag (!%p140_p9), [#allocation3], %s159_s19  ;;  %s584_s26 = int_to_ptr.vmem [resolvable:$true] %s278_s26 }
  0x13   : > { %s419_s4 = scalar_lea.vmem (!%p140_p9), %s584_s26, 128 }
  0x14   : > { %371 = vmatpush3.bf16.msra.mxu0 (!%p140_p9), %v370_v7  ;;  %p420_p11 = scmp.ne.s32.totalorder (!%p140_p9), %s584_s26, %s419_s4 }
  0x15   : > { %s163_s5 = scalar_select %p162_p10, %s529_s16, 1 }
  0x16   : > { %p421_p12 = pnand %p420_p11, %p546_p5  ;;  %s487_s16 = smov [#allocation2]  }
  0x17   : > { %s342_s6 = sshll.u32 %s163_s5, 3  ;;  %s423_s5 = sshll.u32 %s487_s16, 4  ;;  %s424_s5 = int_to_ptr.vmem [resolvable:$false] %s423_s5 }
  0x18   : > { %s165_s9 = scalar_lea.vmem %s625_s0, %s342_s6  ;;  %p422_p13 = pneg %p421_p12 }
  0x19   : > { %v166_v8 = vld [vmem:[%s165_s9] sm:$0xff]  ;;  %s425_s6 = scalar_lea.vmem %s424_s5, 256  ;;  %p426_p0 = scmp.lt.s32.totalorder %s584_s26, %s424_s5 }
  0x1a   : > { %364 = vmatmul.mubr.msk.f32.vlgmr.msra.gmra.mrb[0].mxu0 %vm178_vm1, %v166_v8  ;;  %p427_p1 = scmp.lt.s32.totalorder %s425_s6, %s419_s4 }
  0x1c   : > { %p428_p2 = por %p427_p1, %p426_p0 }
  0x1e   : > { %p429_p3 = pnand %p428_p2, %p422_p13 }
  0xed   : > { %v248_v10 = vpop.f32.mrb[0].mxu0 }
  0xee   : > { %v249_v11 = vadd.f32 %v343_v9, %v248_v10  ;;  %v365_v12 = vpop.f32.mrb[1].mxu0 }
  0xf0   : > { %v345_v13 = vmul.f32 -1.442695, %v249_v11 }
  0xf2   : > { %415 = vpow2.f32 %v345_v13 }
  0xfc   : > { %v416_v14 = vpop.eup %415 }
  0xfd   : > { %v255_v15 = vadd.f32 1.0, %v416_v14 }
  0xff   : > { %417 = vrcp.f32 %v255_v15 }
 0x109   : > { %v418_v16 = vpop.eup %417 }
 0x10a   : > { %259 = vrot.lane.b32.xlu0 %v418_v16, %s486_s17 }
 0x17c   : > { %v260_v17 = vpop.permute.xlu0 %259 }
 0x17d   : > { %v262_v18 = vmul.f32 %v260_v17, %v249_v11 }
 0x17f   : > { %263 = vst.msk [vmem:[%s161_s25] sm:$0xff] %vm178_vm1, %v262_v18 }
 0x180   : > { %432 = shalt.err (!%p429_p3)
}
 0x181   : > { %s433_s7 = scalar_lea.hbm %s582_s29, 128  ;;  %s437_s10 = scalar_lea.hbm %s628_s3, 256 }
 0x182   : > { %p434_p4 = scmp.ne.s32.totalorder %s582_s29, %s433_s7  ;;  %p438_p9 = scmp.lt.u32.totalorder %s582_s29, %s628_s3 }
 0x183   : > { %p439_p10 = scmp.lt.u32.totalorder %s437_s10, %s433_s7  ;;  %p441_p12 = scmp.lt.u32.totalorder %s433_s7, %s582_s29 }
 0x184   : > { %p435_p7 = pnand %p434_p4, %p546_p5 }
 0x185   : > { %p440_p11 = por %p439_p10, %p438_p9 }
 0x186   : > { %p436_p8 = pneg %p435_p7 }
 0x187   : > { %p442_p13 = por %p441_p12, %p440_p11 }
 0x189   : > { %p443_p0 = pnand %p442_p13, %p436_p8 }
 0x18b   : > { %446 = shalt.err (!%p443_p0)
}
 0x18c   : > { %372 = dma.vmem_to_hbm [thread:$0]  (%p546_p5), %s584_s26, 128, %s582_s29, %s265_s30  }
 0x18d PF: > { %p378_p1 = scmp.ge.s32.totalorder %s481_s15, 2  ;;  %s290_s19 = sand.u32 1, %s469_s12  }
 0x18e   : > { %s291_s20 = scalar_lea.sflag [#allocation3], %s290_s19 }
 0x18f   : > { %p375_p2 = pnand %p378_p1, %p550_p6 }
 0x191   : > { %464 = dma.done.wait (!%p375_p2), %s291_s20, 128  }
 0x192   : > { %466 = vsyncadd (!%p375_p2), %s291_s20, 4294967168  ;;  %p13_p3 = scmp.ge.s32.totalorder %s533_s18, 4   ;;  %s631_s12 = smov %s473_s13 }
 0x193   : > { %s632_s13 = smov %s477_s14  ;;  %s633_s14 = smov %s544_s21 }
 0x194   : > { %s634_s15 = smov %s533_s18  ;;  %15 = sbr.rel (!%p13_p3) target bundleno = 3 (0x3), region = 67 }
 0x19b   :  { %296 = vsyncpa [#allocation3], 1 }
 0x19c   :  { %298 = vsyncpa [#allocation3 + $0x1], 1 }

</bundles_post_ra>
